<compile_context>
chip_gen: v5e
topology: v5e:2x2
jax: 0.10.0
libtpu: 0.0.40
codegen_flags: <defaults>
</compile_context>

<pallas_src>
import functools
from typing import List, Optional

import jax
import jax.numpy as jnp
from jax.experimental import pallas as pl
from jax.experimental.pallas import tpu as pltpu

LANE = 128
NEG_INF = -1e30  # finite "−inf": exp(NEG_INF - m) underflows to exactly 0


def _round_up(x: int, m: int) -> int:
    return (x + m - 1) // m * m


# ----------------------------------------------------------------------------
# Kernels
# ----------------------------------------------------------------------------
def _mlp_kernel(x_ref, w1_ref, b1_ref, w2_ref, b2_ref, o_ref):
    # expert_scale_proj: Linear -> ReLU -> Linear   (all operands lane-padded)
    h = jnp.dot(x_ref[...], w1_ref[...], preferred_element_type=jnp.float32) + b1_ref[...]
    h = jnp.maximum(h, 0.0)
    y = jnp.dot(h, w2_ref[...], preferred_element_type=jnp.float32) + b2_ref[...]
    o_ref[...] = y.astype(o_ref.dtype)


def _fused_kernel(x_ref, w1_ref, b1_ref, w2_ref, b2_ref, wb_ref, bb_ref, o_ref,
                  *, D: int, P: int):
    # MLP (h stays in registers/VMEM — never round-trips to HBM)
    h = jnp.dot(x_ref[...], w1_ref[...], preferred_element_type=jnp.float32) + b1_ref[...]
    h = jnp.maximum(h, 0.0)
    h = jnp.dot(h, w2_ref[...], preferred_element_type=jnp.float32) + b2_ref[...]

    # All D factor heads as one block-diagonal matmul: (TB, Hp) @ (Hp, D*P).
    logits = jnp.dot(h, wb_ref[...], preferred_element_type=jnp.float32) + bb_ref[...]

    # Per-head softmax over its own 128-lane group (static, 128-aligned slices).
    for d in range(D):
        l = logits[:, d * P:(d + 1) * P]
        m = jnp.max(l, axis=-1, keepdims=True)
        e = jnp.exp(l - m)
        s = jnp.sum(e, axis=-1, keepdims=True)
        probs = e * pl.reciprocal(s, approx=True)
        o_ref[:, d * P:(d + 1) * P] = probs.astype(o_ref.dtype)


# ----------------------------------------------------------------------------
# Parameters: logical init + lane-dense packing
# ----------------------------------------------------------------------------
def init_params(key, backbone_dim: int, vector_size_per_factor: int,
                num_factors: List[int]):
    """Logical parameters (PyTorch-Linear-like uniform fan-in init).

    Linear weights stored as [in_features, out_features]; biases as [out]."""
    D = len(num_factors)
    V = vector_size_per_factor
    H = D * V

    def lin(k, fan_in, fan_out):
        kw, kb = jax.random.split(k)
        bound = 1.0 / jnp.sqrt(jnp.float32(fan_in))
        w = jax.random.uniform(kw, (fan_in, fan_out), jnp.float32, -bound, bound)
        b = jax.random.uniform(kb, (fan_out,), jnp.float32, -bound, bound)
        return w, b

    keys = jax.random.split(key, 2 + D)
    w1, b1 = lin(keys[0], backbone_dim, H)
    w2, b2 = lin(keys[1], H, H)
    heads = [lin(keys[2 + i], V, out_dim + 1) for i, out_dim in enumerate(num_factors)]
    return {"w1": w1, "b1": b1, "w2": w2, "b2": b2, "heads": heads}


def pack_params(params, backbone_dim: int, vector_size_per_factor: int,
                num_factors: List[int]):
    """Zero-pad to lane-dense (multiples of 128) and pack all factor heads into
    one block-diagonal weight.  Padded head logit columns get a -1e30 bias so
    they vanish under the softmax."""
    D = len(num_factors)
    V = vector_size_per_factor
    H = D * V
    Kp = _round_up(backbone_dim, LANE)
    Hp = _round_up(H, LANE)
    P = LANE                                   # per-head padded output width
    assert max(num_factors) + 1 <= P, "factor head wider than one lane group"

    f32 = jnp.float32
    w1p = jnp.zeros((Kp, Hp), f32).at[:backbone_dim, :H].set(params["w1"])
    b1p = jnp.zeros((1, Hp), f32).at[0, :H].set(params["b1"])
    w2p = jnp.zeros((Hp, Hp), f32).at[:H, :H].set(params["w2"])
    b2p = jnp.zeros((1, Hp), f32).at[0, :H].set(params["b2"])

    wb = jnp.zeros((Hp, D * P), f32)
    bb = jnp.full((1, D * P), NEG_INF, f32)
    for d, (w, b) in enumerate(params["heads"]):
        npd = w.shape[1]                       # num_factors[d] + 1
        wb = wb.at[d * V:(d + 1) * V, d * P:d * P + npd].set(w)
        bb = bb.at[0, d * P:d * P + npd].set(b)

    meta = dict(backbone_dim=backbone_dim, V=V, D=D, H=H, Kp=Kp, Hp=Hp, P=P,
                num_factors=tuple(int(n) for n in num_factors))
    return {"w1": w1p, "b1": b1p, "w2": w2p, "b2": b2p,
            "wb": wb, "bb": bb, "meta": meta}


# ----------------------------------------------------------------------------
# Forward
# ----------------------------------------------------------------------------
def supervised_learner_forward(packed, x,
                               actions: Optional[jnp.ndarray] = None,
                               test: bool = True,
                               *,
                               block_b: int = 1024):
    """Matches SupervisedLearner.forward semantics.

    test=True  -> tensor [B, D*V]
    test=False -> list of tensors, each [B, num_factors[i] + 1] (softmaxed)
    """
    meta = packed["meta"]
    K, D, V, H = meta["backbone_dim"], meta["D"], meta["V"], meta["H"]
    Kp, Hp, P = meta["Kp"], meta["Hp"], meta["P"]
    num_factors = meta["num_factors"]

    B = x.shape[0]
    # Batch tile: multiple of 8 sublanes, capped for VMEM (safe on v5e/v6e/v7x).
    TB = min(block_b, _round_up(B, 8))
    Bp = _round_up(B, TB)
    grid = (Bp // TB,)

    # Lane/sublane-pad the input (zero rows/cols are numerically inert).
    xp = jnp.zeros((Bp, Kp), jnp.float32).at[:B, :K].set(x.astype(jnp.float32))

    resident = lambda i: (0, 0)                 # weights stay in VMEM across tiles
    base_in_specs = [
        pl.BlockSpec((TB, Kp), lambda i: (i, 0)),   # x tile
        pl.BlockSpec((Kp, Hp), resident),           # w1
        pl.BlockSpec((1, Hp), resident),            # b1
        pl.BlockSpec((Hp, Hp), resident),           # w2
        pl.BlockSpec((1, Hp), resident),            # b2
    ]
    cparams = pltpu.CompilerParams(
        dimension_semantics=("parallel",),
        vmem_limit_bytes=32 * 1024 * 1024,
    )

    if test:
        flops = 2 * Bp * (Kp * Hp + Hp * Hp)
        bytes_accessed = 4 * (Bp * Kp + Kp * Hp + Hp + Hp * Hp + Hp + Bp * Hp)
        out = pl.pallas_call(
            _mlp_kernel,
            out_shape=jax.ShapeDtypeStruct((Bp, Hp), jnp.float32),
            grid=grid,
            in_specs=base_in_specs,
            out_specs=pl.BlockSpec((TB, Hp), lambda i: (i, 0)),
            compiler_params=cparams,
            cost_estimate=pl.CostEstimate(flops=flops, transcendentals=0,
                                          bytes_accessed=bytes_accessed),
        )(xp, packed["w1"], packed["b1"], packed["w2"], packed["b2"])
        return out[:B, :H]

    # test=False: fused MLP + all factor heads + softmax, one launch.
    flops = 2 * Bp * (Kp * Hp + Hp * Hp + Hp * D * P)
    transcendentals = Bp * (D * P + D)
    bytes_accessed = 4 * (Bp * Kp + Kp * Hp + Hp + Hp * Hp + Hp
                          + Hp * D * P + D * P + Bp * D * P)
    out = pl.pallas_call(
        functools.partial(_fused_kernel, D=D, P=P),
        out_shape=jax.ShapeDtypeStruct((Bp, D * P), jnp.float32),
        grid=grid,
        in_specs=base_in_specs + [
            pl.BlockSpec((Hp, D * P), resident),    # block-diagonal head weights
            pl.BlockSpec((1, D * P), resident),     # head biases (-1e30 padding)
        ],
        out_specs=pl.BlockSpec((TB, D * P), lambda i: (i, 0)),
        compiler_params=cparams,
        cost_estimate=pl.CostEstimate(flops=flops, transcendentals=transcendentals,
                                      bytes_accessed=bytes_accessed),
    )(xp, packed["w1"], packed["b1"], packed["w2"], packed["b2"],
      packed["wb"], packed["bb"])
    return [out[:B, d * P:d * P + nf + 1] for d, nf in enumerate(num_factors)]


# ----------------------------------------------------------------------------
# Pure-JAX reference for sanity check
# ----------------------------------------------------------------------------
def _ref_forward(params, x, test, num_factors, V):
    h = jnp.maximum(x @ params["w1"] + params["b1"], 0.0) @ params["w2"] + params["b2"]
    if test:
        return h
    D = len(num_factors)
    h3 = h.reshape(h.shape[0], D, V)
    return [jax.nn.softmax(h3[:, i, :] @ w + b, axis=-1)
            for i, (w, b) in enumerate(params["heads"])]


if __name__ == "__main__":
    # Small shapes consistent with the module.
    backbone_dim = 32
    vector_size_per_factor = 16
    num_factors = [5, 7, 3]
    num_actions = 4  # unused in forward
    B = 8

    key = jax.random.PRNGKey(0)
    k_params, k_x = jax.random.split(key)
    params = init_params(k_params, backbone_dim, vector_size_per_factor, num_factors)
    packed = pack_params(params, backbone_dim, vector_size_per_factor, num_factors)
    x = jax.random.normal(k_x, (B, backbone_dim), jnp.float32)

    # test=True path: returns [B, D*V]
    out_test = supervised_learner_forward(packed, x, test=True)
    out_test = jax.block_until_ready(out_test)

    # test=False path: list of softmaxed per-factor distributions
    out_train = supervised_learner_forward(packed, x, test=False)
    out_train = [jax.block_until_ready(o) for o in out_train]

    # Sanity check vs pure-JAX reference.
    ref_test = _ref_forward(params, x, True, num_factors, vector_size_per_factor)
    ref_train = _ref_forward(params, x, False, num_factors, vector_size_per_factor)

    D = len(num_factors)
    assert out_test.shape == (B, D * vector_size_per_factor)
    assert jnp.allclose(out_test, ref_test, atol=1e-4, rtol=1e-4)
    for o, r, nf in zip(out_train, ref_train, num_factors):
        assert o.shape == (B, nf + 1)
        # approx reciprocal in the softmax denom -> slightly looser tolerance
        assert jnp.allclose(o, r, atol=5e-3, rtol=5e-3)
        assert jnp.allclose(jnp.sum(o, axis=-1), 1.0, atol=5e-3)

    print("KERNEL_OK")
</pallas_src>

<mosaic_0001>
module attributes {stable_mosaic.version = 11 : i64} {
  func.func @_mlp_kernel(%arg0: i32, %arg1: memref<8x128xf32, #tpu.memory_space<vmem>>, %arg2: memref<128x128xf32, #tpu.memory_space<vmem>>, %arg3: memref<1x128xf32, #tpu.memory_space<vmem>>, %arg4: memref<128x128xf32, #tpu.memory_space<vmem>>, %arg5: memref<1x128xf32, #tpu.memory_space<vmem>>, %arg6: memref<8x128xf32, #tpu.memory_space<vmem>>) attributes {dimension_semantics = [#tpu.dimension_semantics<parallel>], iteration_bounds = array<i64: 1>, scalar_prefetch = 0 : i64, scratch_operands = 0 : i64, tpu.core_type = #tpu.core_type<tc>, window_params = [{transform_indices = @transform_0, window_bounds = array<i64: 8, 128>}, {pipeline_mode = #tpu.pipeline_mode<synchronous>, transform_indices = @transform_1, window_bounds = array<i64: 128, 128>}, {pipeline_mode = #tpu.pipeline_mode<synchronous>, transform_indices = @transform_2, window_bounds = array<i64: 1, 128>}, {pipeline_mode = #tpu.pipeline_mode<synchronous>, transform_indices = @transform_3, window_bounds = array<i64: 128, 128>}, {pipeline_mode = #tpu.pipeline_mode<synchronous>, transform_indices = @transform_4, window_bounds = array<i64: 1, 128>}, {transform_indices = @transform_5, window_bounds = array<i64: 8, 128>}]} {
    %c0 = arith.constant 0 : index
    %c0_0 = arith.constant 0 : index
    %0 = vector.load %arg1[%c0, %c0_0] : memref<8x128xf32, #tpu.memory_space<vmem>>, vector<8x128xf32>
    %c0_1 = arith.constant 0 : index
    %c0_2 = arith.constant 0 : index
    %1 = vector.load %arg2[%c0_1, %c0_2] : memref<128x128xf32, #tpu.memory_space<vmem>>, vector<128x128xf32>
    %cst = arith.constant dense<0.000000e+00> : vector<8x128xf32>
    %2 = tpu.matmul %0, %1, %cst {dimension_numbers = #tpu.dot_dimension_numbers<[1], [0], [0], [1], [0, 0, 1, 1], [], []>} : vector<8x128xf32>, vector<128x128xf32>, vector<8x128xf32> -> vector<8x128xf32>
    %c0_3 = arith.constant 0 : index
    %c0_4 = arith.constant 0 : index
    %3 = vector.load %arg3[%c0_3, %c0_4] : memref<1x128xf32, #tpu.memory_space<vmem>>, vector<1x128xf32>
    %4 = vector.broadcast %3 : vector<1x128xf32> to vector<8x128xf32>
    %5 = arith.addf %2, %4 : vector<8x128xf32>
    %cst_5 = arith.constant 0.000000e+00 : f32
    %6 = vector.broadcast %cst_5 : f32 to vector<8x128xf32>
    %7 = arith.maximumf %5, %6 : vector<8x128xf32>
    %c0_6 = arith.constant 0 : index
    %c0_7 = arith.constant 0 : index
    %8 = vector.load %arg4[%c0_6, %c0_7] : memref<128x128xf32, #tpu.memory_space<vmem>>, vector<128x128xf32>
    %cst_8 = arith.constant dense<0.000000e+00> : vector<8x128xf32>
    %9 = tpu.matmul %7, %8, %cst_8 {dimension_numbers = #tpu.dot_dimension_numbers<[1], [0], [0], [1], [0, 0, 1, 1], [], []>} : vector<8x128xf32>, vector<128x128xf32>, vector<8x128xf32> -> vector<8x128xf32>
    %c0_9 = arith.constant 0 : index
    %c0_10 = arith.constant 0 : index
    %10 = vector.load %arg5[%c0_9, %c0_10] : memref<1x128xf32, #tpu.memory_space<vmem>>, vector<1x128xf32>
    %11 = vector.broadcast %10 : vector<1x128xf32> to vector<8x128xf32>
    %12 = arith.addf %9, %11 : vector<8x128xf32>
    %c0_11 = arith.constant 0 : index
    %c0_12 = arith.constant 0 : index
    %13 = vector.load %arg6[%c0_11, %c0_12] : memref<8x128xf32, #tpu.memory_space<vmem>>, vector<8x128xf32>
    tpu.vector_store %arg6[%c0_11, %c0_12], %12 {strides = array<i32>} : memref<8x128xf32, #tpu.memory_space<vmem>>, vector<8x128xf32>,
    return
  }
  func.func @transform_0(%arg0: i32) -> (i32, i32) {
    %c0_i32 = arith.constant 0 : i32
    %c0_i32_0 = arith.constant 0 : i32
    return %arg0, %c0_i32 : i32, i32
  }
  func.func @transform_1(%arg0: i32) -> (i32, i32) {
    %c0_i32 = arith.constant 0 : i32
    %c0_i32_0 = arith.constant 0 : i32
    %c0_i32_1 = arith.constant 0 : i32
    return %c0_i32, %c0_i32_0 : i32, i32
  }
  func.func @transform_2(%arg0: i32) -> (i32, i32) {
    %c0_i32 = arith.constant 0 : i32
    %c0_i32_0 = arith.constant 0 : i32
    %c0_i32_1 = arith.constant 0 : i32
    return %c0_i32, %c0_i32_0 : i32, i32
  }
  func.func @transform_3(%arg0: i32) -> (i32, i32) {
    %c0_i32 = arith.constant 0 : i32
    %c0_i32_0 = arith.constant 0 : i32
    %c0_i32_1 = arith.constant 0 : i32
    return %c0_i32, %c0_i32_0 : i32, i32
  }
  func.func @transform_4(%arg0: i32) -> (i32, i32) {
    %c0_i32 = arith.constant 0 : i32
    %c0_i32_0 = arith.constant 0 : i32
    %c0_i32_1 = arith.constant 0 : i32
    return %c0_i32, %c0_i32_0 : i32, i32
  }
  func.func @transform_5(%arg0: i32) -> (i32, i32) {
    %c0_i32 = arith.constant 0 : i32
    %c0_i32_0 = arith.constant 0 : i32
    return %arg0, %c0_i32 : i32, i32
  }
}

</mosaic_0001>

<bundles_post_ra>
// kernel: tpu_custom_call.1
= control target key start
LH: loop header
LB: loop body
LE: loop exit
PB: predicated region body
PF: predicated region fallthrough
CT: control target
= control target key end

     0   :  { %10 = vsyncpa [#allocation3], 0  ;;  %s331_s0 = inlined_call_operand.hbm [shape: f32[8,128], index: 0, kind: input, shape index: {}]   ;;  %s332_s1 = inlined_call_operand.hbm [shape: f32[128,128], index: 1, kind: input, shape index: {}]   ;;  %s333_s2 = inlined_call_operand.vmem [shape: f32[1,128], index: 2, kind: input, shape index: {}]   ;;  %s334_s3 = inlined_call_operand.hbm [shape: f32[128,128], index: 3, kind: input, shape index: {}]   ;;  %s335_s4 = inlined_call_operand.vmem [shape: f32[1,128], index: 4, kind: input, shape index: {}]   ;;  %s336_s5 = inlined_call_operand.hbm [shape: f32[8,128], index: 5, kind: output, shape index: {}]  }
   0x1   :  { %11 = vsyncpa [#allocation6], 0  ;;  %s28_s20 = sshll.u32 %s332_s1, 4  ;;  %s29_s20 = int_to_ptr.hbm [resolvable:$true] %s28_s20 }
   0x2   :  { %12 = vsyncpa [#allocation4], 0  ;;  %s277_s21 = smov [#allocation5]   ;;  %s18_s25 = sshll.u32 %s331_s0, 4  ;;  %s19_s25 = int_to_ptr.hbm [resolvable:$true] %s18_s25 }
   0x3   :  { %s30_s22 = sshll.u32 %s277_s21, 4  ;;  %s278_s26 = smov 128   ;;  %s31_s22 = int_to_ptr.vmem [resolvable:$true] %s30_s22 }
   0x4   :  { %s279_s27 = smov 8   ;;  %s280_s28 = smov [#allocation2]  }
   0x5   :  { %36 = dma.hbm_to_vmem [thread:$0]  %s29_s20, 2048, %s31_s22, [#allocation6], %s278_s26, %s278_s26, %s279_s27  }
   0x6   :  { %s20_s29 = sshll.u32 %s280_s28, 4  ;;  %s43_s7 = sshll.u32 %s334_s3, 4  ;;  %s21_s29 = int_to_ptr.vmem [resolvable:$true] %s20_s29  ;;  %s44_s7 = int_to_ptr.hbm [resolvable:$true] %s43_s7 }
   0x7   :  { %23 = dma.hbm_to_vmem [thread:$0]  %s19_s25, 128, %s21_s29, [#allocation3]  }
   0x8   :  { %s281_s1 = smov [#allocation7]  }
   0x9   :  { %s45_s8 = sshll.u32 %s281_s1, 4  ;;  %s46_s8 = int_to_ptr.vmem [resolvable:$true] %s45_s8 }
   0xa   :  { %51 = dma.hbm_to_vmem [thread:$0]  %s44_s7, 2048, %s46_s8, [#allocation6], %s278_s26, %s278_s26, %s279_s27  }
   0xb   :  { %271 = dma.done.wait [#allocation3], 128  }
   0xc   :  { %272 = vsyncadd [#allocation3], 4294967168 }
   0xd   :  { %273 = dma.done.wait [#allocation6], 4096  }
   0xe   :  { %274 = vsyncadd [#allocation6], 4294963200  ;;  %v82_v0 = vld [vmem:[#allocation5 + $0x78] sm:$0xff]  ;;  %v81_v1 = vld [vmem:[#allocation5 + $0x70] sm:$0xff]  ;;  %s282_s11 = smov [#allocation8]   ;;  %s156_s15 = sshll.u32 %s336_s5, 4  ;;  %s157_s15 = int_to_ptr.hbm [resolvable:$true] %s156_s15 }
   0xf   :  { %87 = vmatpush.msra.mxu0 %v82_v0  ;;  %v80_v2 = vld [vmem:[#allocation5 + $0x68] sm:$0xff]  ;;  %v79_v3 = vld [vmem:[#allocation5 + $0x60] sm:$0xff]  ;;  %v123_v4 = vld [vmem:[#allocation7 + $0x78] sm:$0xff]  ;;  %s154_s12 = sshll.u32 %s282_s11, 4  ;;  %s155_s12 = int_to_ptr.vmem [resolvable:$true] %s154_s12 }
  0x10   :  { %v78_v5 = vld [vmem:[#allocation5 + $0x58] sm:$0xff]  ;;  %128 = vmatpush.msra.mxu1 %v123_v4  ;;  %v122_v6 = vld [vmem:[#allocation7 + $0x70] sm:$0xff]  ;;  %v121_v7 = vld [vmem:[#allocation7 + $0x68] sm:$0xff] }
  0x11   :  { %88 = vmatpush.msra.mxu0 %v81_v1  ;;  %v77_v8 = vld [vmem:[#allocation5 + $0x50] sm:$0xff]  ;;  %v120_v9 = vld [vmem:[#allocation7 + $0x60] sm:$0xff]  ;;  %v76_v10 = vld [vmem:[#allocation5 + $0x48] sm:$0xff] }
  0x12   :  { %129 = vmatpush.msra.mxu1 %v122_v6  ;;  %v119_v11 = vld [vmem:[#allocation7 + $0x58] sm:$0xff]  ;;  %v75_v12 = vld [vmem:[#allocation5 + $0x40] sm:$0xff]  ;;  %v118_v13 = vld [vmem:[#allocation7 + $0x50] sm:$0xff] }
  0x13   :  { %89 = vmatpush.msra.mxu0 %v80_v2  ;;  %v74_v14 = vld [vmem:[#allocation5 + $0x38] sm:$0xff]  ;;  %v117_v15 = vld [vmem:[#allocation7 + $0x48] sm:$0xff]  ;;  %v73_v16 = vld [vmem:[#allocation5 + $0x30] sm:$0xff] }
  0x14   :  { %130 = vmatpush.msra.mxu1 %v121_v7  ;;  %v116_v17 = vld [vmem:[#allocation7 + $0x40] sm:$0xff]  ;;  %v72_v18 = vld [vmem:[#allocation5 + $0x28] sm:$0xff]  ;;  %v115_v19 = vld [vmem:[#allocation7 + $0x38] sm:$0xff] }
  0x15   :  { %90 = vmatpush.msra.mxu0 %v79_v3  ;;  %v71_v20 = vld [vmem:[#allocation5 + $0x20] sm:$0xff]  ;;  %v114_v21 = vld [vmem:[#allocation7 + $0x30] sm:$0xff]  ;;  %v70_v22 = vld [vmem:[#allocation5 + $0x18] sm:$0xff] }
  0x16   :  { %131 = vmatpush.msra.mxu1 %v120_v9  ;;  %v113_v23 = vld [vmem:[#allocation7 + $0x28] sm:$0xff]  ;;  %v69_v24 = vld [vmem:[#allocation5 + $0x10] sm:$0xff]  ;;  %v112_v25 = vld [vmem:[#allocation7 + $0x20] sm:$0xff] }
  0x17   :  { %91 = vmatpush.msra.mxu0 %v78_v5  ;;  %v68_v26 = vld [vmem:[#allocation5 + $0x8] sm:$0xff]  ;;  %v111_v27 = vld [vmem:[#allocation7 + $0x18] sm:$0xff]  ;;  %v67_v28 = vld [vmem:[#allocation5] sm:$0xff] }
  0x18   :  { %132 = vmatpush.msra.mxu1 %v119_v11  ;;  %v66_v29 = vld [vmem:[#allocation2] sm:$0xff]  ;;  %v110_v30 = vld [vmem:[#allocation7 + $0x10] sm:$0xff]  ;;  %v109_v31 = vld [vmem:[#allocation7 + $0x8] sm:$0xff] }
  0x19   :  { %92 = vmatpush.msra.mxu0 %v77_v8  ;;  %v108_v32 = vld [vmem:[#allocation7] sm:$0xff]  ;;  %v173_v33 = vld [vmem:[%s333_s2] ss:$0 sm:$0xff] }
  0x1a   :  { %133 = vmatpush.msra.mxu1 %v118_v13  ;;  %v174_v37 = vld [vmem:[%s335_s4] ss:$0 sm:$0xff] }
  0x1b   :  { %93 = vmatpush.msra.mxu0 %v76_v10 }
  0x1c   :  { %134 = vmatpush.msra.mxu1 %v117_v15 }
  0x1d   :  { %94 = vmatpush.msra.mxu0 %v75_v12 }
  0x1e   :  { %135 = vmatpush.msra.mxu1 %v116_v17 }
  0x1f   :  { %95 = vmatpush.msra.mxu0 %v74_v14 }
  0x20   :  { %136 = vmatpush.msra.mxu1 %v115_v19 }
  0x21   :  { %96 = vmatpush.msra.mxu0 %v73_v16 }
  0x22   :  { %137 = vmatpush.msra.mxu1 %v114_v21 }
  0x23   :  { %97 = vmatpush.msra.mxu0 %v72_v18 }
  0x24   :  { %138 = vmatpush.msra.mxu1 %v113_v23 }
  0x25   :  { %98 = vmatpush.msra.mxu0 %v71_v20 }
  0x26   :  { %139 = vmatpush.msra.mxu1 %v112_v25 }
  0x27   :  { %99 = vmatpush.msra.mxu0 %v70_v22 }
  0x28   :  { %140 = vmatpush.msra.mxu1 %v111_v27 }
  0x29   :  { %100 = vmatpush.msra.mxu0 %v69_v24 }
  0x2a   :  { %141 = vmatpush.msra.mxu1 %v110_v30 }
  0x2b   :  { %101 = vmatpush.msra.mxu0 %v68_v26 }
  0x2c   :  { %142 = vmatpush.msra.mxu1 %v109_v31 }
  0x2d   :  { %102 = vmatpush.msra.mxu0 %v67_v28 }
  0x2e   :  { %103 = vmatmul.f32.vlgmr.msra.gmra.mxu0 %v66_v29  ;;  %143 = vmatpush.msra.mxu1 %v108_v32 }
  0xab   :  { %v104_v34 = vpop.f32.mrf.mxu0 }
  0xac   :  { %v105_v35 = vadd.f32 %v173_v33, %v104_v34 }
  0xae   :  { %v107_v36 = vmax.f32 %v105_v35, 0.0 }
  0xb0   :  { %144 = vmatmul.f32.vlgmr.msra.gmra.mxu1 %v107_v36 }
 0x12d   :  { %v145_v38 = vpop.f32.mrf.mxu1 }
 0x12e   :  { %v146_v39 = vadd.f32 %v174_v37, %v145_v38 }
 0x130   :  { %148 = vst [vmem:[#allocation8] sm:$0xff] %v146_v39 }
 0x131   :  { %159 = dma.vmem_to_hbm [thread:$0]  %s155_s12, 128, %s157_s15, [#allocation4]  }
 0x132   :  { %275 = dma.done.wait [#allocation4], 128  }
 0x133   :  { %276 = vsyncadd [#allocation4], 4294967168 }
 0x134   :  { %164 = vsyncpa [#allocation3], 1 }
 0x135   :  { %165 = vsyncpa [#allocation6], 1 }
 0x136   :  { %166 = vsyncpa [#allocation4], 1 }

</bundles_post_ra>
